<compile_context>
chip_gen: v7x
topology: tpu7x:2x2x1
jax: 0.10.0
libtpu: 0.0.40
codegen_flags: <defaults>
</compile_context>

<pallas_src>
import functools

import jax
import jax.numpy as jnp
from jax import lax
from jax.experimental import pallas as pl
from jax.experimental.pallas import tpu as pltpu

_LANES = 128
_SUBLANES = 8


def _quantile_loss_kernel(tau_ref, pred_ref, targ_ref, out_ref, *,
                          rows, eff_tile, steps, full_blocks, needs_mask):
    c = pl.program_id(0)   # split (parallel axis, one per TensorCore on v7x)
    i = pl.program_id(1)   # sequential step within split

    # The c-indexed output block is the accumulator: zero it on the first step.
    @pl.when(i == 0)
    def _():
        out_ref[...] = jnp.zeros_like(out_ref)

    tau = tau_ref[0]
    err = targ_ref[...].astype(jnp.float32) - pred_ref[...].astype(jnp.float32)

    def accumulate(e):
        # pinball / quantile loss: max((tau-1)*e, tau*e)
        loss = jnp.maximum((tau - 1.0) * e, tau * e)
        # Fold (eff_tile, 128) -> (8, 128): pure vreg-add tree (VPU only, no
        # XLU, no tile-sized accumulator traffic).
        out_ref[...] += loss.reshape(-1, _SUBLANES, _LANES).sum(axis=0)

    if not needs_mask:
        # Static fast path: every grid step owns a full, real block.
        accumulate(err)
    else:
        # Logical (unclamped) block index decides which rows this step owns.
        b_log = c * steps + i

        @pl.when(b_log < full_blocks)
        def _():
            # Full in-bounds block: unmasked hot path (no iota/compare/select).
            accumulate(err)

        @pl.when(b_log >= full_blocks)
        def _():
            # Partial last block, or a clamped step past the end: mask the
            # out-of-range rows to zero before the two muls (one select).
            row0 = b_log * eff_tile
            row_ids = row0 + lax.broadcasted_iota(jnp.int32, err.shape, 0)
            accumulate(jnp.where(row_ids < rows, err, 0.0))


def _default_num_splits():
    # 2-way split only pays off on 2-TensorCore chips (v7x); on 1-TC v5e/v6e it
    # just adds redundant clamped steps.
    try:
        kind = jax.devices()[0].device_kind.lower()
    except Exception:
        return 1
    return 2 if "v7" in kind else 1


def quantile_loss(predictions, targets, tau, *, row_tile=4096, num_splits=None):
    """Mean quantile (pinball) loss via a Pallas TPU kernel.

    predictions, targets: arrays of identical shape (any dtype; cast to f32
    inside the kernel so HBM traffic stays at the native width).
    tau: quantile level (python float or 0-d array).
    Returns a scalar float32 (the mean loss), matching torch .mean().
    """
    assert predictions.shape == targets.shape
    n = predictions.size
    if n == 0:
        return jnp.float32(jnp.nan)  # torch.mean over empty tensor is NaN

    if num_splits is None:
        num_splits = _default_num_splits()

    flat_p = predictions.reshape(-1)   # native dtype, no wrapper upcast
    flat_t = targets.reshape(-1)

    rem = n % _LANES
    if rem:
        # Rare fallback (size not a multiple of 128): pad both with identical
        # zeros -> error 0 -> loss 0 -> contributes nothing; divide by n below.
        pad = _LANES - rem
        flat_p = jnp.concatenate([flat_p, jnp.zeros((pad,), flat_p.dtype)])
        flat_t = jnp.concatenate([flat_t, jnp.zeros((pad,), flat_t.dtype)])

    rows = flat_p.size // _LANES
    p2d = flat_p.reshape(rows, _LANES)   # free reshape of a contiguous buffer
    t2d = flat_t.reshape(rows, _LANES)

    # Effective row tile: multiple of 8 (sublane), capped near the array size.
    # 4096 rows f32 => 2 MiB/block, 8 MiB double-buffered for two inputs: fits
    # the default scoped VMEM on v5e (16 MiB), v6e (32 MiB) and v7x (32 MiB).
    row_tile = max(_SUBLANES, (row_tile // _SUBLANES) * _SUBLANES)
    rows_rounded = ((rows + _SUBLANES - 1) // _SUBLANES) * _SUBLANES
    eff_tile = min(row_tile, rows_rounded)

    nblocks = pl.cdiv(rows, eff_tile)
    splits = num_splits if nblocks >= num_splits else 1
    steps = pl.cdiv(nblocks, splits)

    full_blocks = rows // eff_tile                       # guaranteed-full blocks
    needs_mask = (rows % eff_tile != 0) or (splits * steps != nblocks)

    tau_arr = jnp.asarray([tau], dtype=jnp.float32)

    kernel = functools.partial(
        _quantile_loss_kernel, rows=rows, eff_tile=eff_tile, steps=steps,
        full_blocks=full_blocks, needs_mask=needs_mask)

    def data_map(c, i):
        # Clamp: steps past the last real block re-read it (and mask to zero).
        return (jnp.minimum(c * steps + i, nblocks - 1), 0)

    partials = pl.pallas_call(
        kernel,
        # (splits*8, 128) partials: cleanly (8,128)-aligned output blocks, no
        # masked partial stores; final reduction happens in the wrapper.
        out_shape=jax.ShapeDtypeStruct((splits * _SUBLANES, _LANES), jnp.float32),
        grid_spec=pltpu.PrefetchScalarGridSpec(
            num_scalar_prefetch=0,
            grid=(splits, steps),
            in_specs=[
                pl.BlockSpec(memory_space=pltpu.MemorySpace.SMEM),  # tau
                pl.BlockSpec((eff_tile, _LANES), data_map),         # predictions
                pl.BlockSpec((eff_tile, _LANES), data_map),         # targets
            ],
            # Output block indexed by c only -> resident accumulator per split.
            out_specs=pl.BlockSpec((_SUBLANES, _LANES), lambda c, i: (c, 0)),
        ),
        compiler_params=pltpu.CompilerParams(
            dimension_semantics=("parallel", "arbitrary"),
        ),
    )(tau_arr, p2d, t2d)

    return jnp.sum(partials) / jnp.float32(n)


def quantile_loss_ref(predictions, targets, tau):
    errors = targets.astype(jnp.float32) - predictions.astype(jnp.float32)
    return jnp.mean(jnp.maximum((tau - 1.0) * errors, tau * errors))


if __name__ == "__main__":
    key = jax.random.PRNGKey(0)
    kp, kt = jax.random.split(key)

    # Small shapes consistent with a regression head: (batch=128, features=256)
    predictions = jax.random.normal(kp, (128, 256), dtype=jnp.float32)
    targets = jax.random.normal(kt, (128, 256), dtype=jnp.float32)
    tau = 0.9

    out = jax.block_until_ready(quantile_loss(predictions, targets, tau))
    ref = quantile_loss_ref(predictions, targets, tau)
    assert jnp.allclose(out, ref, rtol=1e-5, atol=1e-5), (out, ref)

    # Second check: ragged row count + tiny tile + forced 2-way split exercises
    # the multi-step accumulation, the masked partial last block, and the
    # clamped redundant step (all zero-contribution by construction).
    kp2, kt2 = jax.random.split(kt)
    p2 = jax.random.normal(kp2, (33, 128), dtype=jnp.float32)
    t2 = jax.random.normal(kt2, (33, 128), dtype=jnp.float32)
    out2 = jax.block_until_ready(
        quantile_loss(p2, t2, 0.3, row_tile=8, num_splits=2))
    ref2 = quantile_loss_ref(p2, t2, 0.3)
    assert jnp.allclose(out2, ref2, rtol=1e-5, atol=1e-5), (out2, ref2)

    print("KERNEL_OK")
</pallas_src>

<mosaic_0001>
module attributes {stable_mosaic.version = 11 : i64} {
  func.func @_quantile_loss_kernel(%arg0: i32, %arg1: i32, %arg2: memref<1xf32, #tpu.memory_space<smem>>, %arg3: memref<256x128xf32, #tpu.memory_space<vmem>>, %arg4: memref<256x128xf32, #tpu.memory_space<vmem>>, %arg5: memref<8x128xf32, #tpu.memory_space<vmem>>) attributes {dimension_semantics = [#tpu.dimension_semantics<parallel>, #tpu.dimension_semantics<arbitrary>], iteration_bounds = array<i64: 1, 1>, scalar_prefetch = 0 : i64, scratch_operands = 0 : i64, tpu.core_type = #tpu.core_type<tc>, window_params = [{transform_indices = @transform_0, window_bounds = array<i64: 1>}, {transform_indices = @transform_1, window_bounds = array<i64: 256, 128>}, {transform_indices = @transform_2, window_bounds = array<i64: 256, 128>}, {transform_indices = @transform_3, window_bounds = array<i64: 8, 128>}]} {
    %c0_i32 = arith.constant 0 : i32
    %0 = arith.cmpi eq, %arg1, %c0_i32 : i32
    %1 = arith.extui %0 : i1 to i32
    %c0_i32_0 = arith.constant 0 : i32
    %2 = arith.cmpi ne, %1, %c0_i32_0 : i32
    scf.if %2 {
      %cst_10 = arith.constant 0.000000e+00 : f32
      %18 = vector.broadcast %cst_10 : f32 to vector<8x128xf32>
      %c0_11 = arith.constant 0 : index
      %c0_12 = arith.constant 0 : index
      %19 = vector.load %arg5[%c0_11, %c0_12] : memref<8x128xf32, #tpu.memory_space<vmem>>, vector<8x128xf32>
      tpu.vector_store %arg5[%c0_11, %c0_12], %18 {strides = array<i32>} : memref<8x128xf32, #tpu.memory_space<vmem>>, vector<8x128xf32>,
    } else {
    }
    %c0 = arith.constant 0 : index
    %3 = memref.load %arg2[%c0] : memref<1xf32, #tpu.memory_space<smem>>
    %c0_1 = arith.constant 0 : index
    %c0_2 = arith.constant 0 : index
    %4 = vector.load %arg4[%c0_1, %c0_2] : memref<256x128xf32, #tpu.memory_space<vmem>>, vector<256x128xf32>
    %c0_3 = arith.constant 0 : index
    %c0_4 = arith.constant 0 : index
    %5 = vector.load %arg3[%c0_3, %c0_4] : memref<256x128xf32, #tpu.memory_space<vmem>>, vector<256x128xf32>
    %6 = arith.subf %4, %5 : vector<256x128xf32>
    %cst = arith.constant 1.000000e+00 : f32
    %7 = arith.subf %3, %cst : f32
    %8 = vector.broadcast %7 : f32 to vector<256x128xf32>
    %9 = arith.mulf %8, %6 : vector<256x128xf32>
    %10 = vector.broadcast %3 : f32 to vector<256x128xf32>
    %11 = arith.mulf %10, %6 : vector<256x128xf32>
    %12 = arith.maximumf %9, %11 : vector<256x128xf32>
    %c0_5 = arith.constant 0 : index
    %c0_6 = arith.constant 0 : index
    %13 = vector.load %arg5[%c0_5, %c0_6] : memref<8x128xf32, #tpu.memory_space<vmem>>, vector<8x128xf32>
    %14 = vector.shape_cast %12 : vector<256x128xf32> to vector<32x8x128xf32>
    %cst_7 = arith.constant dense<0.000000e+00> : vector<8x128xf32>
    %15 = vector.multi_reduction <add>, %14, %cst_7 [0] : vector<32x8x128xf32> to vector<8x128xf32>
    %16 = arith.addf %13, %15 : vector<8x128xf32>
    %c0_8 = arith.constant 0 : index
    %c0_9 = arith.constant 0 : index
    %17 = vector.load %arg5[%c0_8, %c0_9] : memref<8x128xf32, #tpu.memory_space<vmem>>, vector<8x128xf32>
    tpu.vector_store %arg5[%c0_8, %c0_9], %16 {strides = array<i32>} : memref<8x128xf32, #tpu.memory_space<vmem>>, vector<8x128xf32>,
    return
  }
  func.func @transform_0(%arg0: i32, %arg1: i32) -> i32 {
    %c0_i32 = arith.constant 0 : i32
    %c0_i32_0 = arith.constant 0 : i32
    return %c0_i32 : i32
  }
  func.func @transform_1(%arg0: i32, %arg1: i32) -> (i32, i32) {
    %c1_i32 = arith.constant 1 : i32
    %0 = arith.muli %arg0, %c1_i32 : i32
    %1 = arith.addi %0, %arg1 : i32
    %c0_i32 = arith.constant 0 : i32
    %2 = arith.minsi %1, %c0_i32 : i32
    %c0_i32_0 = arith.constant 0 : i32
    %c0_i32_1 = arith.constant 0 : i32
    return %2, %c0_i32_0 : i32, i32
  }
  func.func @transform_2(%arg0: i32, %arg1: i32) -> (i32, i32) {
    %c1_i32 = arith.constant 1 : i32
    %0 = arith.muli %arg0, %c1_i32 : i32
    %1 = arith.addi %0, %arg1 : i32
    %c0_i32 = arith.constant 0 : i32
    %2 = arith.minsi %1, %c0_i32 : i32
    %c0_i32_0 = arith.constant 0 : i32
    %c0_i32_1 = arith.constant 0 : i32
    return %2, %c0_i32_0 : i32, i32
  }
  func.func @transform_3(%arg0: i32, %arg1: i32) -> (i32, i32) {
    %c0_i32 = arith.constant 0 : i32
    %c0_i32_0 = arith.constant 0 : i32
    return %arg0, %c0_i32 : i32, i32
  }
}

</mosaic_0001>

<bundles_post_ra>
// kernel: tpu_custom_call.1
= control target key start
LH: loop header
LB: loop body
LE: loop exit
PB: predicated region body
PF: predicated region fallthrough
CT: control target
= control target key end

     0   :  { %9 = vsyncpa [#allocation4], 0  ;;  %s533_s0 = inlined_call_operand.<no memory space> [shape: f32[1], index: 0, kind: input, shape index: {}]   ;;  %s534_s1 = inlined_call_operand.hbm [shape: f32[256,128], index: 1, kind: input, shape index: {}]   ;;  %s535_s2 = inlined_call_operand.hbm [shape: f32[256,128], index: 2, kind: input, shape index: {}]   ;;  %s536_s3 = inlined_call_operand.hbm [shape: f32[8,128], index: 3, kind: output, shape index: {}]  }
   0x1   :  { %10 = vsyncpa [#allocation7], 0 }
   0x2   :  { %11 = vsyncpa [#allocation5], 0  ;;  %s398_s12 = smov [#allocation3]   ;;  %s326_s16 = scalar_lea.hbm %s534_s1, 4096 }
   0x3   :  { %s25_s13 = sshll.u32 %s398_s12, 4  ;;  %p327_p0 = scmp.ne.s32.totalorder %s534_s1, %s326_s16  ;;  %s26_s13 = int_to_ptr.vmem [resolvable:$true] %s25_s13 }
   0x4   :  { %p330_p1 = scmp.lt.u32.totalorder %s326_s16, %s534_s1 }
   0x6   :  { %p332_p2 = pnand %p330_p1, %p327_p0 }
   0x8   :  { %335 = shalt.err (!%p332_p2)
}
   0x9   :  { %s336_s21 = scalar_lea.vmem %s26_s13, 4096  ;;  %p341_p4 = scmp.lt.s32.totalorder %s26_s13, %s26_s13 }
   0xa   :  { %p337_p3 = scmp.ne.s32.totalorder %s26_s13, %s336_s21  ;;  %p342_p5 = scmp.lt.s32.totalorder %s336_s21, %s336_s21 }
   0xc   :  { %p343_p6 = por %p342_p5, %p341_p4 }
   0xe   :  { %p344_p7 = pnand %p343_p6, %p337_p3 }
  0x10   :  { %347 = shalt.err (!%p344_p7)
}
  0x11   :  { %s399_s22 = smov 128   ;;  %s400_s23 = smov 8  }
  0x12   :  { %31 = dma.hbm_to_vmem [thread:$0]  %s534_s1, 4096, %s26_s13, [#allocation4], %s399_s22, %s399_s22, %s400_s23  }
  0x13   :  { %s401_s26 = smov [#allocation6]   ;;  %s348_s30 = scalar_lea.hbm %s535_s2, 4096 }
  0x14   :  { %s43_s27 = sshll.u32 %s401_s26, 4  ;;  %p349_p8 = scmp.ne.s32.totalorder %s535_s2, %s348_s30  ;;  %s44_s27 = int_to_ptr.vmem [resolvable:$true] %s43_s27 }
  0x15   :  { %p352_p9 = scmp.lt.u32.totalorder %s348_s30, %s535_s2 }
  0x17   :  { %p354_p10 = pnand %p352_p9, %p349_p8 }
  0x19   :  { %357 = shalt.err (!%p354_p10)
}
  0x1a   :  { %s358_s8 = scalar_lea.vmem %s44_s27, 4096  ;;  %p363_p12 = scmp.lt.s32.totalorder %s44_s27, %s44_s27 }
  0x1b   :  { %p359_p11 = scmp.ne.s32.totalorder %s44_s27, %s358_s8  ;;  %p364_p13 = scmp.lt.s32.totalorder %s358_s8, %s358_s8 }
  0x1d   :  { %p365_p0 = por %p364_p13, %p363_p12 }
  0x1f   :  { %p366_p1 = pnand %p365_p0, %p359_p11 }
  0x21   :  { %369 = shalt.err (!%p366_p1)
}
  0x22   :  { %49 = dma.hbm_to_vmem [thread:$0]  %s535_s2, 4096, %s44_s27, [#allocation7], %s399_s22, %s399_s22, %s400_s23  }
  0x23   :  { %392 = dma.done.wait [#allocation4], 4096  }
  0x24   :  { %393 = vsyncadd [#allocation4], 4294963200 }
  0x25   :  { %394 = dma.done.wait [#allocation7], 4096  }
  0x26   :  { %395 = vsyncadd [#allocation7], 4294963200  ;;  %v70_v0 = vld [vmem:[#allocation6] sm:$0xff]  ;;  %v71_v1 = vld [vmem:[#allocation6 + $0x8] sm:$0xff]  ;;  %s319_s12 = sadd.f32 -1.0, %s533_s0  ;;  %v455_v11 = vstv %s533_s0  ;;  %s402_s0 = smov [#allocation8]  }
  0x27   :  { %v102_v2 = vld [vmem:[#allocation3] sm:$0xff]  ;;  %v103_v3 = vld [vmem:[#allocation3 + $0x8] sm:$0xff]  ;;  %v72_v4 = vld [vmem:[#allocation6 + $0x10] sm:$0xff]  ;;  %s305_s14 = sshll.u32 %s402_s0, 4  ;;  %s306_s14 = int_to_ptr.vmem [resolvable:$true] %s305_s14 }
  0x28   :  { %v104_v5 = vld [vmem:[#allocation3 + $0x10] sm:$0xff]  ;;  %v73_v6 = vld [vmem:[#allocation6 + $0x18] sm:$0xff]  ;;  %v134_v8 = vsub.f32 %v70_v0, %v102_v2  ;;  %v135_v9 = vsub.f32 %v71_v1, %v103_v3  ;;  %v450_v10 = vstv %s319_s12  ;;  %v74_v13 = vld [vmem:[#allocation6 + $0x20] sm:$0xff]  ;;  %s370_s15 = scalar_lea.vmem %s306_s14, 128  ;;  %p375_p3 = scmp.lt.s32.totalorder %s306_s14, %s306_s14 }
  0x29   :  { %v105_v7 = vld [vmem:[#allocation3 + $0x18] sm:$0xff]  ;;  %v136_v12 = vsub.f32 %v72_v4, %v104_v5  ;;  %v106_v14 = vld [vmem:[#allocation3 + $0x20] sm:$0xff]  ;;  %v75_v16 = vld [vmem:[#allocation6 + $0x28] sm:$0xff]  ;;  %p371_p2 = scmp.ne.s32.totalorder %s306_s14, %s370_s15  ;;  %p376_p4 = scmp.lt.s32.totalorder %s370_s15, %s370_s15 }
  0x2a   :  { %v137_v15 = vsub.f32 %v73_v6, %v105_v7  ;;  %v107_v17 = vld [vmem:[#allocation3 + $0x28] sm:$0xff]  ;;  %v168_v18 = vmul.f32 %v450_v10, %v134_v8  ;;  %v169_v19 = vmul.f32 %v450_v10, %v135_v9  ;;  %v201_v20 = vmul.f32 %v455_v11, %v134_v8  ;;  %v76_v25 = vld [vmem:[#allocation6 + $0x30] sm:$0xff]  ;;  %v77_v28 = vld [vmem:[#allocation6 + $0x38] sm:$0xff] }
  0x2b   :  { %v202_v21 = vmul.f32 %v455_v11, %v135_v9  ;;  %v138_v22 = vsub.f32 %v74_v13, %v106_v14  ;;  %v170_v23 = vmul.f32 %v450_v10, %v136_v12  ;;  %v203_v24 = vmul.f32 %v455_v11, %v136_v12  ;;  %v108_v26 = vld [vmem:[#allocation3 + $0x30] sm:$0xff]  ;;  %v109_v29 = vld [vmem:[#allocation3 + $0x38] sm:$0xff]  ;;  %v78_v34 = vld [vmem:[#allocation6 + $0x40] sm:$0xff]  ;;  %p377_p5 = por %p376_p4, %p375_p3 }
  0x2c   :  { %v139_v27 = vsub.f32 %v75_v16, %v107_v17  ;;  %v171_v30 = vmul.f32 %v450_v10, %v137_v15  ;;  %v204_v31 = vmul.f32 %v455_v11, %v137_v15  ;;  %v233_v32 = vmax.f32 %v168_v18, %v201_v20  ;;  %v110_v35 = vld [vmem:[#allocation3 + $0x40] sm:$0xff]  ;;  %v79_v41 = vld [vmem:[#allocation6 + $0x48] sm:$0xff]  ;;  %v80_v48 = vld [vmem:[#allocation6 + $0x50] sm:$0xff] }
  0x2d   :  { %v234_v33 = vmax.f32 %v169_v19, %v202_v21  ;;  %v140_v36 = vsub.f32 %v76_v25, %v108_v26  ;;  %v172_v37 = vmul.f32 %v450_v10, %v138_v22  ;;  %v205_v38 = vmul.f32 %v455_v11, %v138_v22  ;;  %v111_v42 = vld [vmem:[#allocation3 + $0x48] sm:$0xff]  ;;  %v112_v49 = vld [vmem:[#allocation3 + $0x50] sm:$0xff]  ;;  %v81_v55 = vld [vmem:[#allocation6 + $0x58] sm:$0xff]  ;;  %p378_p6 = pnand %p377_p5, %p371_p2 }
  0x2e   :  { %v235_v39 = vmax.f32 %v170_v23, %v203_v24  ;;  %v141_v40 = vsub.f32 %v77_v28, %v109_v29  ;;  %v173_v43 = vmul.f32 %v450_v10, %v139_v27  ;;  %v206_v44 = vmul.f32 %v455_v11, %v139_v27  ;;  %v113_v56 = vld [vmem:[#allocation3 + $0x58] sm:$0xff]  ;;  %v82_v62 = vld [vmem:[#allocation6 + $0x60] sm:$0xff]  ;;  %v83_v5 = vld [vmem:[#allocation6 + $0x68] sm:$0xff] }
  0x2f   :  { %v236_v45 = vmax.f32 %v171_v30, %v204_v31  ;;  %v266_v46 = vadd.f32 %v234_v33, %v233_v32  ;;  %v142_v47 = vsub.f32 %v78_v34, %v110_v35  ;;  %v174_v50 = vmul.f32 %v450_v10, %v140_v36  ;;  %v114_v63 = vld [vmem:[#allocation3 + $0x60] sm:$0xff]  ;;  %v115_v6 = vld [vmem:[#allocation3 + $0x68] sm:$0xff]  ;;  %v84_v14 = vld [vmem:[#allocation6 + $0x70] sm:$0xff] }
  0x30   :  { %v207_v51 = vmul.f32 %v455_v11, %v140_v36  ;;  %v237_v52 = vmax.f32 %v172_v37, %v205_v38  ;;  %v143_v54 = vsub.f32 %v79_v41, %v111_v42  ;;  %v175_v57 = vmul.f32 %v450_v10, %v141_v40  ;;  %v116_v15 = vld [vmem:[#allocation3 + $0x70] sm:$0xff]  ;;  %v85_v21 = vld [vmem:[#allocation6 + $0x78] sm:$0xff]  ;;  %v86_v28 = vld [vmem:[#allocation6 + $0x80] sm:$0xff] }
  0x31   :  { %v267_v53 = vadd.f32 %v266_v46, %v235_v39  ;;  %v208_v58 = vmul.f32 %v455_v11, %v141_v40  ;;  %v238_v59 = vmax.f32 %v173_v43, %v206_v44  ;;  %v144_v61 = vsub.f32 %v80_v48, %v112_v49  ;;  %v117_v22 = vld [vmem:[#allocation3 + $0x78] sm:$0xff]  ;;  %v118_v29 = vld [vmem:[#allocation3 + $0x80] sm:$0xff]  ;;  %v87_v35 = vld [vmem:[#allocation6 + $0x88] sm:$0xff] }
  0x32   :  { %v176_v0 = vmul.f32 %v450_v10, %v142_v47  ;;  %v209_v1 = vmul.f32 %v455_v11, %v142_v47  ;;  %v239_v2 = vmax.f32 %v174_v50, %v207_v51  ;;  %v145_v4 = vsub.f32 %v81_v55, %v113_v56  ;;  %v119_v36 = vld [vmem:[#allocation3 + $0x88] sm:$0xff]  ;;  %v88_v42 = vld [vmem:[#allocation6 + $0x90] sm:$0xff]  ;;  %v89_v49 = vld [vmem:[#allocation6 + $0x98] sm:$0xff] }
  0x33   :  { %v268_v60 = vadd.f32 %v267_v53, %v236_v45  ;;  %v177_v7 = vmul.f32 %v450_v10, %v143_v54  ;;  %v210_v8 = vmul.f32 %v455_v11, %v143_v54  ;;  %v240_v9 = vmax.f32 %v175_v57, %v208_v58  ;;  %v120_v43 = vld [vmem:[#allocation3 + $0x90] sm:$0xff]  ;;  %v121_v50 = vld [vmem:[#allocation3 + $0x98] sm:$0xff]  ;;  %v90_v56 = vld [vmem:[#allocation6 + $0xa0] sm:$0xff] }
  0x34   :  { %v146_v13 = vsub.f32 %v82_v62, %v114_v63  ;;  %v178_v16 = vmul.f32 %v450_v10, %v144_v61  ;;  %v211_v17 = vmul.f32 %v455_v11, %v144_v61  ;;  %v241_v18 = vmax.f32 %v176_v0, %v209_v1  ;;  %v122_v57 = vld [vmem:[#allocation3 + $0xa0] sm:$0xff]  ;;  %v91_v63 = vld [vmem:[#allocation6 + $0xa8] sm:$0xff] }
  0x35   :  { %v269_v3 = vadd.f32 %v268_v60, %v237_v52  ;;  %v147_v20 = vsub.f32 %v83_v5, %v115_v6  ;;  %v179_v23 = vmul.f32 %v450_v10, %v145_v4  ;;  %v212_v24 = vmul.f32 %v455_v11, %v145_v4  ;;  %v123_v0 = vld [vmem:[#allocation3 + $0xa8] sm:$0xff]  ;;  %v92_v6 = vld [vmem:[#allocation6 + $0xb0] sm:$0xff] }
  0x36   :  { %v242_v25 = vmax.f32 %v177_v7, %v210_v8  ;;  %v148_v27 = vsub.f32 %v84_v14, %v116_v15  ;;  %v180_v30 = vmul.f32 %v450_v10, %v146_v13  ;;  %v213_v31 = vmul.f32 %v455_v11, %v146_v13  ;;  %v124_v7 = vld [vmem:[#allocation3 + $0xb0] sm:$0xff]  ;;  %v93_v15 = vld [vmem:[#allocation6 + $0xb8] sm:$0xff] }
  0x37   :  { %v270_v12 = vadd.f32 %v269_v3, %v238_v59  ;;  %v243_v32 = vmax.f32 %v178_v16, %v211_v17  ;;  %v149_v34 = vsub.f32 %v85_v21, %v117_v22  ;;  %v181_v37 = vmul.f32 %v450_v10, %v147_v20  ;;  %v125_v16 = vld [vmem:[#allocation3 + $0xb8] sm:$0xff]  ;;  %v94_v22 = vld [vmem:[#allocation6 + $0xc0] sm:$0xff] }
  0x38   :  { %v214_v38 = vmul.f32 %v455_v11, %v147_v20  ;;  %v244_v39 = vmax.f32 %v179_v23, %v212_v24  ;;  %v150_v41 = vsub.f32 %v86_v28, %v118_v29  ;;  %v182_v44 = vmul.f32 %v450_v10, %v148_v27  ;;  %v126_v23 = vld [vmem:[#allocation3 + $0xc0] sm:$0xff]  ;;  %v95_v29 = vld [vmem:[#allocation6 + $0xc8] sm:$0xff] }
  0x39   :  { %v271_v19 = vadd.f32 %v270_v12, %v239_v2  ;;  %v215_v45 = vmul.f32 %v455_v11, %v148_v27  ;;  %v245_v46 = vmax.f32 %v180_v30, %v213_v31  ;;  %v151_v48 = vsub.f32 %v87_v35, %v119_v36  ;;  %v127_v30 = vld [vmem:[#allocation3 + $0xc8] sm:$0xff]  ;;  %v96_v36 = vld [vmem:[#allocation6 + $0xd0] sm:$0xff] }
  0x3a   :  { %v183_v51 = vmul.f32 %v450_v10, %v149_v34  ;;  %v216_v52 = vmul.f32 %v455_v11, %v149_v34  ;;  %v246_v53 = vmax.f32 %v181_v37, %v214_v38  ;;  %v152_v55 = vsub.f32 %v88_v42, %v120_v43  ;;  %v128_v37 = vld [vmem:[#allocation3 + $0xd0] sm:$0xff]  ;;  %v97_v43 = vld [vmem:[#allocation6 + $0xd8] sm:$0xff] }
  0x3b   :  { %v272_v26 = vadd.f32 %v271_v19, %v240_v9  ;;  %v184_v58 = vmul.f32 %v450_v10, %v150_v41  ;;  %v217_v59 = vmul.f32 %v455_v11, %v150_v41  ;;  %v247_v60 = vmax.f32 %v182_v44, %v215_v45  ;;  %v129_v44 = vld [vmem:[#allocation3 + $0xd8] sm:$0xff] }
  0x3c   :  { %v153_v62 = vsub.f32 %v89_v49, %v121_v50  ;;  %v185_v1 = vmul.f32 %v450_v10, %v151_v48  ;;  %v218_v2 = vmul.f32 %v455_v11, %v151_v48  ;;  %v248_v3 = vmax.f32 %v183_v51, %v216_v52  ;;  %v98_v50 = vld [vmem:[#allocation6 + $0xe0] sm:$0xff] }
  0x3d   :  { %v273_v33 = vadd.f32 %v272_v26, %v241_v18  ;;  %v154_v5 = vsub.f32 %v90_v56, %v122_v57  ;;  %v186_v8 = vmul.f32 %v450_v10, %v152_v55  ;;  %v219_v9 = vmul.f32 %v455_v11, %v152_v55  ;;  %v130_v51 = vld [vmem:[#allocation3 + $0xe0] sm:$0xff]  ;;  %v99_v57 = vld [vmem:[#allocation6 + $0xe8] sm:$0xff] }
  0x3e   :  { %v249_v12 = vmax.f32 %v184_v58, %v217_v59  ;;  %v155_v14 = vsub.f32 %v91_v63, %v123_v0  ;;  %v187_v17 = vmul.f32 %v450_v10, %v153_v62  ;;  %v220_v18 = vmul.f32 %v455_v11, %v153_v62  ;;  %v131_v58 = vld [vmem:[#allocation3 + $0xe8] sm:$0xff]  ;;  %v100_v0 = vld [vmem:[#allocation6 + $0xf0] sm:$0xff] }
  0x3f   :  { %v274_v40 = vadd.f32 %v273_v33, %v242_v25  ;;  %v250_v19 = vmax.f32 %v185_v1, %v218_v2  ;;  %v156_v21 = vsub.f32 %v92_v6, %v124_v7  ;;  %v188_v24 = vmul.f32 %v450_v10, %v154_v5  ;;  %v132_v1 = vld [vmem:[#allocation3 + $0xf0] sm:$0xff]  ;;  %v101_v7 = vld [vmem:[#allocation6 + $0xf8] sm:$0xff] }
  0x40   :  { %v221_v25 = vmul.f32 %v455_v11, %v154_v5  ;;  %v251_v26 = vmax.f32 %v186_v8, %v219_v9  ;;  %v157_v28 = vsub.f32 %v93_v15, %v125_v16  ;;  %v189_v31 = vmul.f32 %v450_v10, %v155_v14  ;;  %v133_v8 = vld [vmem:[#allocation3 + $0xf8] sm:$0xff] }
  0x41   :  { %v275_v47 = vadd.f32 %v274_v40, %v243_v32  ;;  %v222_v32 = vmul.f32 %v455_v11, %v155_v14  ;;  %v252_v33 = vmax.f32 %v187_v17, %v220_v18  ;;  %v158_v35 = vsub.f32 %v94_v22, %v126_v23 }
  0x42   :  { %v190_v38 = vmul.f32 %v450_v10, %v156_v21  ;;  %v253_v40 = vmax.f32 %v188_v24, %v221_v25  ;;  %v159_v42 = vsub.f32 %v95_v29, %v127_v30  ;;  %v191_v45 = vmul.f32 %v450_v10, %v157_v28 }
  0x43   :  { %v276_v54 = vadd.f32 %v275_v47, %v244_v39  ;;  %v223_v39 = vmul.f32 %v455_v11, %v156_v21  ;;  %v254_v47 = vmax.f32 %v189_v31, %v222_v32  ;;  %v160_v49 = vsub.f32 %v96_v36, %v128_v37 }
  0x44   :  { %v192_v52 = vmul.f32 %v450_v10, %v158_v35  ;;  %v161_v56 = vsub.f32 %v97_v43, %v129_v44  ;;  %v193_v59 = vmul.f32 %v450_v10, %v159_v42  ;;  %v162_v63 = vsub.f32 %v98_v50, %v130_v51 }
  0x45   :  { %v277_v61 = vadd.f32 %v276_v54, %v245_v46  ;;  %v224_v46 = vmul.f32 %v455_v11, %v157_v28  ;;  %v255_v54 = vmax.f32 %v190_v38, %v223_v39  ;;  %v194_v2 = vmul.f32 %v450_v10, %v160_v49 }
  0x46   :  { %v163_v6 = vsub.f32 %v99_v57, %v131_v58  ;;  %v195_v9 = vmul.f32 %v450_v10, %v161_v56  ;;  %v164_v15 = vsub.f32 %v100_v0, %v132_v1  ;;  %v196_v16 = vmul.f32 %v450_v10, %v162_v63 }
  0x47   :  { %v278_v4 = vadd.f32 %v277_v61, %v246_v53  ;;  %v225_v53 = vmul.f32 %v455_v11, %v158_v35  ;;  %v256_v61 = vmax.f32 %v191_v45, %v224_v46  ;;  %v229_v17 = vmul.f32 %v455_v11, %v162_v63 }
  0x48   :  { %v197_v21 = vmul.f32 %v450_v10, %v163_v6  ;;  %v230_v22 = vmul.f32 %v455_v11, %v163_v6  ;;  %v198_v25 = vmul.f32 %v450_v10, %v164_v15 }
  0x49   :  { %v279_v13 = vadd.f32 %v278_v4, %v247_v60  ;;  %v226_v60 = vmul.f32 %v455_v11, %v159_v42  ;;  %v257_v4 = vmax.f32 %v192_v52, %v225_v53 }
  0x4a   :  { %v262_v31 = vmax.f32 %v197_v21, %v230_v22 }
  0x4b   :  { %v280_v20 = vadd.f32 %v279_v13, %v248_v3  ;;  %v227_v3 = vmul.f32 %v455_v11, %v160_v49  ;;  %v258_v13 = vmax.f32 %v193_v59, %v226_v60 }
  0x4d   :  { %v281_v27 = vadd.f32 %v280_v20, %v249_v12  ;;  %v228_v12 = vmul.f32 %v455_v11, %v161_v56  ;;  %v259_v18 = vmax.f32 %v194_v2, %v227_v3  ;;  %v165_v20 = vsub.f32 %v101_v7, %v133_v8 }
  0x4f   :  { %v282_v34 = vadd.f32 %v281_v27, %v250_v19  ;;  %v260_v23 = vmax.f32 %v195_v9, %v228_v12  ;;  %v261_v27 = vmax.f32 %v196_v16, %v229_v17  ;;  %v199_v29 = vmul.f32 %v450_v10, %v165_v20 }
  0x50   :  { %v232_v30 = vmul.f32 %v455_v11, %v165_v20 }
  0x51   :  { %v283_v41 = vadd.f32 %v282_v34, %v251_v26  ;;  %v231_v26 = vmul.f32 %v455_v11, %v164_v15 }
  0x52   :  { %v264_v35 = vmax.f32 %v199_v29, %v232_v30 }
  0x53   :  { %v284_v48 = vadd.f32 %v283_v41, %v252_v33  ;;  %v263_v33 = vmax.f32 %v198_v25, %v231_v26 }
  0x55   :  { %v285_v55 = vadd.f32 %v284_v48, %v253_v40 }
  0x57   :  { %v286_v62 = vadd.f32 %v285_v55, %v254_v47 }
  0x59   :  { %v287_v5 = vadd.f32 %v286_v62, %v255_v54 }
  0x5b   :  { %v288_v14 = vadd.f32 %v287_v5, %v256_v61 }
  0x5d   :  { %v289_v19 = vadd.f32 %v288_v14, %v257_v4 }
  0x5f   :  { %v290_v24 = vadd.f32 %v289_v19, %v258_v13 }
  0x61   :  { %v291_v28 = vadd.f32 %v290_v24, %v259_v18 }
  0x63   :  { %v292_v32 = vadd.f32 %v291_v28, %v260_v23 }
  0x65   :  { %v293_v34 = vadd.f32 %v292_v32, %v261_v27 }
  0x67   :  { %v294_v36 = vadd.f32 %v293_v34, %v262_v31 }
  0x69   :  { %v295_v37 = vadd.f32 %v294_v36, %v263_v33 }
  0x6b   :  { %v296_v38 = vadd.f32 %v295_v37, %v264_v35 }
  0x6d   :  { %298 = vst [vmem:[#allocation8] sm:$0xff] %v296_v38 }
  0x6e   :  { %381 = shalt.err (!%p378_p6)
}
  0x6f   :  { %s382_s18 = scalar_lea.hbm %s536_s3, 128 }
  0x70   :  { %p383_p7 = scmp.ne.s32.totalorder %s536_s3, %s382_s18  ;;  %p386_p8 = scmp.lt.u32.totalorder %s382_s18, %s536_s3 }
  0x72   :  { %p388_p9 = pnand %p386_p8, %p383_p7 }
  0x74   :  { %391 = shalt.err (!%p388_p9)
}
  0x75   :  { %308 = dma.vmem_to_hbm [thread:$0]  %s306_s14, 128, %s536_s3, [#allocation5]  }
  0x76   :  { %396 = dma.done.wait [#allocation5], 128  }
  0x77   :  { %397 = vsyncadd [#allocation5], 4294967168 }
  0x78   :  { %312 = vsyncpa [#allocation4], 1 }
  0x79   :  { %313 = vsyncpa [#allocation7], 1 }
  0x7a   :  { %314 = vsyncpa [#allocation5], 1 }

</bundles_post_ra>
